<compile_context>
chip_gen: v5e
topology: v5e:2x2
jax: 0.10.0
libtpu: 0.0.40
codegen_flags: <defaults>
</compile_context>

<pallas_src>
import math

import jax
import jax.numpy as jnp
from jax.experimental import pallas as pl
from jax.experimental.pallas import tpu as pltpu


def _round_up(x, m):
    return ((x + m - 1) // m) * m


def code_modulation_kernel(idx_ref, emb_ref, w_ref, b_ref, out_ref):
    # idx_ref : SMEM (1,) int32
    # emb_ref : VMEM (num_signals, code_dim)
    # w_ref   : VMEM (code_dim, num_out)
    # b_ref   : VMEM (1, num_out)
    # out_ref : VMEM (tile_r, L)  with  L % num_out == 0 and L % 128 == 0
    num_out = w_ref.shape[1]
    reps = out_ref.shape[1] // num_out

    idx = idx_ref[0]
    code = emb_ref[pl.ds(idx, 1), :]                                 # (1, code_dim) embedding lookup
    mod = jnp.dot(code, w_ref[...],
                  preferred_element_type=jnp.float32) + b_ref[...]   # (1, num_out)  Linear
    row = jnp.tile(mod, (1, reps))                                   # (1, L) lane-dense row
    # "repeat" over all coordinate positions of this tile: sublane broadcast + full-width stores
    out_ref[...] = jnp.broadcast_to(row, out_ref.shape).astype(out_ref.dtype)


def code_modulation(coords, patient_idx, emb_table, w, b, *,
                    max_tile_bytes=4 * 1024 * 1024, max_lane_width=4096):
    """Pallas implementation of CodeModulation.forward(coords, patient_idx)."""
    lead_shape = coords.shape[:-1]
    n_rows = max(1, math.prod(lead_shape))
    num_out = w.shape[1]
    total = n_rows * num_out

    # Lane-dense slab width: multiple of both 128 (full vreg lanes) and num_out, so the
    # row-major slab is exactly the repeated modulation vector.
    L0 = math.lcm(num_out, 128)
    exact = (total % L0 == 0)
    if exact:
        # Exact-fit path: widen L while it still divides total (wider rows -> fewer, fatter DMAs).
        L = L0
        while L * 2 <= max_lane_width and total % (L * 2) == 0:
            L *= 2
    else:
        # Fallback: lane-dense but padded; the wrapper slices afterwards.
        L = L0
        while L < 512:
            L *= 2

    bytes_per_row = L * 4
    cap_rows = max(8, ((max_tile_bytes // bytes_per_row) // 8) * 8)
    R = pl.cdiv(total, L)

    tile_r = None
    if exact:
        if R <= cap_rows:
            tile_r = R                      # single full-extent block (no padding needed)
            R_out = R
        else:
            # Largest multiple-of-8 divisor of R not exceeding the VMEM tile cap.
            t = cap_rows
            found = 0
            while t >= 8:
                if R % t == 0:
                    found = t
                    break
                t -= 8
            if found >= max(64, cap_rows // 8):
                tile_r = found
                R_out = R
            else:
                exact = False               # only tiny divisors -> prefer big padded tiles

    if not exact:
        tile_r = min(cap_rows, _round_up(R, 8))
        R_out = _round_up(R, tile_r)

    grid = R_out // tile_r

    idx = jnp.asarray([patient_idx], dtype=jnp.int32)

    out_slab = pl.pallas_call(
        code_modulation_kernel,
        out_shape=jax.ShapeDtypeStruct((R_out, L), jnp.float32),
        grid=(grid,),
        in_specs=[
            pl.BlockSpec(memory_space=pltpu.MemorySpace.SMEM),   # patient idx (scalar)
            pl.BlockSpec(emb_table.shape, lambda i: (0, 0)),     # full embedding table (tiny)
            pl.BlockSpec(w.shape, lambda i: (0, 0)),             # full weight
            pl.BlockSpec(b.shape, lambda i: (0, 0)),             # full bias
        ],
        out_specs=pl.BlockSpec((tile_r, L), lambda i: (i, 0)),
        compiler_params=pltpu.CompilerParams(
            dimension_semantics=("parallel",)),                  # megacore-shardable store stream
    )(idx, emb_table, w, b)

    if R_out * L == total:
        # Exact fit: contiguous reshape only (no extra HBM traffic).
        return out_slab.reshape(*lead_shape, num_out)
    # Padded fallback: first `total` elements of the slab are the flattened output
    # (valid because L % num_out == 0).
    out_flat = out_slab.reshape(-1)[:total]
    return out_flat.reshape(*lead_shape, num_out)


if __name__ == "__main__":
    # Small shapes consistent with the module
    num_signals = 4      # num_embeddings
    code_dim = 8         # embedding_dim
    num_out = 32         # Linear out_features
    batch, points, coord_dim = 2, 16, 3
    zero_init = True     # cfg.zero_init

    key = jax.random.PRNGKey(0)
    k_emb, k_w, k_b, k_coords = jax.random.split(key, 4)

    # Parameter init (deterministic, mirrors the torch module's shapes):
    #   Embedding weight: (num_signals, code_dim), ~N(0,1) like torch.nn.Embedding
    emb_table = jax.random.normal(k_emb, (num_signals, code_dim), dtype=jnp.float32)
    #   Linear weight (torch shape (num_out, code_dim)); cfg.zero_init -> uniform(-1e-5, 1e-5)
    if zero_init:
        w_torch = jax.random.uniform(k_w, (num_out, code_dim), jnp.float32,
                                     minval=-1e-5, maxval=1e-5)
    else:
        bound = 1.0 / math.sqrt(code_dim)
        w_torch = jax.random.uniform(k_w, (num_out, code_dim), jnp.float32,
                                     minval=-bound, maxval=bound)
    bound = 1.0 / math.sqrt(code_dim)
    b_torch = jax.random.uniform(k_b, (num_out,), jnp.float32,
                                 minval=-bound, maxval=bound)

    # Kernel-friendly layout
    w = w_torch.T                     # (code_dim, num_out)
    b = b_torch.reshape(1, num_out)   # (1, num_out)

    coords = jax.random.normal(k_coords, (batch, points, coord_dim), dtype=jnp.float32)
    patient_idx = 2

    out = code_modulation(coords, patient_idx, emb_table, w, b)
    out = jax.block_until_ready(out)

    # Pure-JAX reference of the torch forward
    code_ref = emb_table[patient_idx]                       # embedding lookup
    mod_ref = code_ref @ w_torch.T + b_torch                # Linear
    ref = jnp.broadcast_to(mod_ref.reshape(1, 1, num_out),
                           (batch, points, num_out))        # view + repeat

    assert out.shape == (batch, points, num_out), out.shape
    assert jnp.allclose(out, ref, atol=1e-5, rtol=1e-5), "mismatch vs reference"

    print("KERNEL_OK")
</pallas_src>

<mosaic_0001>
module attributes {stable_mosaic.version = 11 : i64} {
  func.func @code_modulation_kernel(%arg0: i32, %arg1: memref<1xi32, #tpu.memory_space<smem>>, %arg2: memref<4x8xf32, #tpu.memory_space<vmem>>, %arg3: memref<8x32xf32, #tpu.memory_space<vmem>>, %arg4: memref<1x32xf32, #tpu.memory_space<vmem>>, %arg5: memref<1x1024xf32, #tpu.memory_space<vmem>>) attributes {dimension_semantics = [#tpu.dimension_semantics<parallel>], iteration_bounds = array<i64: 1>, scalar_prefetch = 0 : i64, scratch_operands = 0 : i64, tpu.core_type = #tpu.core_type<tc>, window_params = [{transform_indices = @transform_0, window_bounds = array<i64: 1>}, {pipeline_mode = #tpu.pipeline_mode<synchronous>, transform_indices = @transform_1, window_bounds = array<i64: 4, 8>}, {pipeline_mode = #tpu.pipeline_mode<synchronous>, transform_indices = @transform_2, window_bounds = array<i64: 8, 32>}, {pipeline_mode = #tpu.pipeline_mode<synchronous>, transform_indices = @transform_3, window_bounds = array<i64: 1, 32>}, {transform_indices = @transform_4, window_bounds = array<i64: 1, 1024>}]} {
    %c0 = arith.constant 0 : index
    %0 = memref.load %arg1[%c0] : memref<1xi32, #tpu.memory_space<smem>>
    %1 = arith.index_cast %0 : i32 to index
    %c0_0 = arith.constant 0 : index
    %2 = vector.load %arg2[%1, %c0_0] : memref<4x8xf32, #tpu.memory_space<vmem>>, vector<1x8xf32>
    %c0_1 = arith.constant 0 : index
    %c0_2 = arith.constant 0 : index
    %3 = vector.load %arg3[%c0_1, %c0_2] : memref<8x32xf32, #tpu.memory_space<vmem>>, vector<8x32xf32>
    %cst = arith.constant dense<0.000000e+00> : vector<1x32xf32>
    %4 = tpu.matmul %2, %3, %cst {dimension_numbers = #tpu.dot_dimension_numbers<[1], [0], [0], [1], [0, 0, 1, 1], [], []>} : vector<1x8xf32>, vector<8x32xf32>, vector<1x32xf32> -> vector<1x32xf32>
    %c0_3 = arith.constant 0 : index
    %c0_4 = arith.constant 0 : index
    %5 = vector.load %arg4[%c0_3, %c0_4] : memref<1x32xf32, #tpu.memory_space<vmem>>, vector<1x32xf32>
    %6 = arith.addf %4, %5 : vector<1x32xf32>
    %7 = tpu.concatenate %6, %6, %6, %6, %6, %6, %6, %6, %6, %6, %6, %6, %6, %6, %6, %6, %6, %6, %6, %6, %6, %6, %6, %6, %6, %6, %6, %6, %6, %6, %6, %6 in 1 : vector<1x32xf32>, vector<1x32xf32>, vector<1x32xf32>, vector<1x32xf32>, vector<1x32xf32>, vector<1x32xf32>, vector<1x32xf32>, vector<1x32xf32>, vector<1x32xf32>, vector<1x32xf32>, vector<1x32xf32>, vector<1x32xf32>, vector<1x32xf32>, vector<1x32xf32>, vector<1x32xf32>, vector<1x32xf32>, vector<1x32xf32>, vector<1x32xf32>, vector<1x32xf32>, vector<1x32xf32>, vector<1x32xf32>, vector<1x32xf32>, vector<1x32xf32>, vector<1x32xf32>, vector<1x32xf32>, vector<1x32xf32>, vector<1x32xf32>, vector<1x32xf32>, vector<1x32xf32>, vector<1x32xf32>, vector<1x32xf32>, vector<1x32xf32> -> vector<1x1024xf32>
    %c0_5 = arith.constant 0 : index
    %c0_6 = arith.constant 0 : index
    %8 = vector.load %arg5[%c0_5, %c0_6] : memref<1x1024xf32, #tpu.memory_space<vmem>>, vector<1x1024xf32>
    tpu.vector_store %arg5[%c0_5, %c0_6], %7 {strides = array<i32>} : memref<1x1024xf32, #tpu.memory_space<vmem>>, vector<1x1024xf32>,
    return
  }
  func.func @transform_0(%arg0: i32) -> i32 {
    %c0_i32 = arith.constant 0 : i32
    %c0_i32_0 = arith.constant 0 : i32
    return %c0_i32 : i32
  }
  func.func @transform_1(%arg0: i32) -> (i32, i32) {
    %c0_i32 = arith.constant 0 : i32
    %c0_i32_0 = arith.constant 0 : i32
    %c0_i32_1 = arith.constant 0 : i32
    return %c0_i32, %c0_i32_0 : i32, i32
  }
  func.func @transform_2(%arg0: i32) -> (i32, i32) {
    %c0_i32 = arith.constant 0 : i32
    %c0_i32_0 = arith.constant 0 : i32
    %c0_i32_1 = arith.constant 0 : i32
    return %c0_i32, %c0_i32_0 : i32, i32
  }
  func.func @transform_3(%arg0: i32) -> (i32, i32) {
    %c0_i32 = arith.constant 0 : i32
    %c0_i32_0 = arith.constant 0 : i32
    %c0_i32_1 = arith.constant 0 : i32
    return %c0_i32, %c0_i32_0 : i32, i32
  }
  func.func @transform_4(%arg0: i32) -> (i32, i32) {
    %c0_i32 = arith.constant 0 : i32
    %c0_i32_0 = arith.constant 0 : i32
    return %arg0, %c0_i32 : i32, i32
  }
}

</mosaic_0001>

<bundles_post_ra>
// kernel: tpu_custom_call.1
= control target key start
LH: loop header
LB: loop body
LE: loop exit
PB: predicated region body
PF: predicated region fallthrough
CT: control target
= control target key end

     0   :  { %10 = vsyncpa [#allocation4], 0  ;;  %s271_s0 = inlined_call_operand.<no memory space> [shape: s32[1], index: 0, kind: input, shape index: {}]   ;;  %s272_s1 = inlined_call_operand.hbm [shape: f32[4,8], index: 1, kind: input, shape index: {}]   ;;  %s273_s2 = inlined_call_operand.hbm [shape: f32[8,32], index: 2, kind: input, shape index: {}]   ;;  %s274_s3 = inlined_call_operand.vmem [shape: f32[1,32], index: 3, kind: input, shape index: {}]   ;;  %s275_s4 = inlined_call_operand.hbm [shape: f32[1,1024], index: 4, kind: output, shape index: {}]  }
   0x1   :  { %11 = vsyncpa [#allocation7], 0 }
   0x2   :  { %12 = vsyncpa [#allocation5], 0  ;;  %s20_s17 = sshll.u32 %s272_s1, 4  ;;  %s220_s18 = smov [#allocation3]   ;;  %s21_s17 = int_to_ptr.hbm [resolvable:$true] %s20_s17 }
   0x3   :  { %s22_s19 = sshll.u32 %s220_s18, 4  ;;  %s31_s22 = sshll.u32 %s273_s2, 4  ;;  %s23_s19 = int_to_ptr.vmem [resolvable:$true] %s22_s19  ;;  %s32_s22 = int_to_ptr.hbm [resolvable:$true] %s31_s22 }
   0x4   :  { %25 = dma.hbm_to_vmem [thread:$0]  %s21_s17, 64, %s23_s19, [#allocation4]  }
   0x5   :  { %s221_s23 = smov [#allocation6]  }
   0x6   :  { %s33_s24 = sshll.u32 %s221_s23, 4  ;;  %s34_s24 = int_to_ptr.vmem [resolvable:$true] %s33_s24 }
   0x7   :  { %36 = dma.hbm_to_vmem [thread:$0]  %s32_s22, 128, %s34_s24, [#allocation7]  }
   0x8   :  { %214 = dma.done.wait [#allocation4], 64  }
   0x9   :  { %215 = vsyncadd [#allocation4], 4294967232 }
   0xa   :  { %216 = dma.done.wait [#allocation7], 128  }
   0xb   :  { %217 = vsyncadd [#allocation7], 4294967168  ;;  %vm52_vm0 = vcmask 64512   ;;  %v50_v0 = vld [vmem:[#allocation6] sm:$0xff]  ;;  %s48_s26 = scalar_lea.vmem [#allocation3], %s271_s0  ;;  %s222_s28 = smov 96  }
   0xc   :  { %v49_v1 = vld [vmem:[%s48_s26] sm:$0x1]  ;;  %71 = vmatpush.msra.mxu0 %v50_v0  ;;  %s223_s29 = smov 32   ;;  %s224_s30 = smov 64   ;;  %vm86_vm1 = vcmask 261120   ;;  %vm88_vm2 = vcmask 523264  }
   0xd   :  { %135 = vmatmul.msk.f32.vlgmr.msra.gmra.mxu0 %vm52_vm0, %v49_v1  ;;  %v51_v2 = vld [vmem:[%s274_s3] sm:$0x1]  ;;  %vm90_vm3 = vcmask 785408   ;;  %vm100_vm4 = vcmask 1040384   ;;  %vm102_vm5 = vcmask 1042434   ;;  %vm104_vm6 = vcmask 1041408  }
   0xe   :  { %vm106_vm7 = vcmask 1044484   ;;  %vm108_vm8 = vcmask 1046534   ;;  %vm110_vm9 = vcmask 1045508   ;;  %s225_s0 = smov [#allocation8]   ;;  %s123_s7 = sshll.u32 %s275_s4, 4  ;;  %vm112_vm10 = vcmask 1043456   ;;  %s124_s7 = int_to_ptr.hbm [resolvable:$true] %s123_s7 }
   0xf   :  { %s121_s3 = sshll.u32 %s225_s0, 4  ;;  %s122_s3 = int_to_ptr.vmem [resolvable:$true] %s121_s3 }
  0x8a   :  { %v73_v3 = vpop.f32.mrf.mxu0 }
  0x8b   :  { %v74_v4 = vadd.f32 %v73_v3, %v51_v2 }
  0x8d   :  { %83 = vrot.lane.b32.xlu1 %v74_v4, %s222_s28  ;;  %77 = vrot.lane.b32.xlu0 %v74_v4, %s223_s29 }
  0x95   :  { %80 = vrot.lane.b32.xlu0 %v74_v4, %s224_s30 }
  0xff   :  { %v78_v5 = vpop.permute.xlu0 %77  ;;  %v84_v8 = vpop.permute.xlu1 %83 }
 0x100   :  { %v87_v6 = vsel %vm86_vm1, %v74_v4, %v78_v5 }
 0x107   :  { %v81_v7 = vpop.permute.xlu0 %80 }
 0x108   :  { %v89_v9 = vsel %vm88_vm2, %v87_v6, %v81_v7 }
 0x109   :  { %v91_v10 = vsel %vm90_vm3, %v89_v9, %v84_v8 }
 0x10a   :  { %v93_v11 = vrot.slane %v91_v10, 7  ;;  %v94_v12 = vrot.slane %v91_v10, 6  ;;  %v95_v13 = vrot.slane %v91_v10, 5  ;;  %v96_v14 = vrot.slane %v91_v10, 4 }
 0x10b   :  { %v97_v15 = vrot.slane %v91_v10, 3  ;;  %v98_v16 = vrot.slane %v91_v10, 2  ;;  %v99_v17 = vrot.slane %v91_v10, 1 }
 0x10c   :  { %v101_v18 = vsel %vm100_vm4, %v91_v10, %v93_v11  ;;  %v103_v19 = vsel %vm102_vm5, %v94_v12, %v95_v13 }
 0x10d   :  { %v105_v20 = vsel %vm104_vm6, %v101_v18, %v103_v19  ;;  %v107_v21 = vsel %vm106_vm7, %v96_v14, %v97_v15  ;;  %v109_v22 = vsel %vm108_vm8, %v98_v16, %v99_v17 }
 0x10e   :  { %v111_v23 = vsel %vm110_vm9, %v107_v21, %v109_v22 }
 0x10f   :  { %v113_v24 = vsel %vm112_vm10, %v105_v20, %v111_v23 }
 0x110   :  { %115 = vst [vmem:[#allocation8] sm:$0xff] %v113_v24 }
 0x111   :  { %126 = dma.vmem_to_hbm [thread:$0]  %s122_s3, 128, %s124_s7, [#allocation5]  }
 0x112   :  { %218 = dma.done.wait [#allocation5], 128  }
 0x113   :  { %219 = vsyncadd [#allocation5], 4294967168 }
 0x114   :  { %131 = vsyncpa [#allocation4], 1 }
 0x115   :  { %132 = vsyncpa [#allocation7], 1 }
 0x116   :  { %133 = vsyncpa [#allocation5], 1 }

</bundles_post_ra>
